<compile_context>
chip_gen: v7x
topology: tpu7x:2x2x1
jax: 0.10.0
libtpu: 0.0.40
codegen_flags: <defaults>
</compile_context>

<pallas_src>
import jax
import jax.numpy as jnp
from jax.experimental import pallas as pl
from jax.experimental.pallas import tpu as pltpu

BN_EPS = 1e-5
ONE_SIXTH = 1.0 / 6.0


def fused_kernel(x_ref, p_ref, o_ref):
    """x_ref: (N, C, P) f32 VMEM  -- zero-padded conv input, spatial flattened.
    p_ref:  (C, C+3) f32 VMEM   -- [conv_w (CxC) | conv_b | bn_gamma | bn_beta].
    o_ref:  (N, C, P) f32 VMEM.
    """
    N, C, P = x_ref.shape

    # All small parameters come from one tiny packed VMEM tile (one DMA).
    w_cols = [p_ref[:, i:i + 1] for i in range(C)]   # each (C, 1): weights of
                                                     # input channel i for all
                                                     # output channels
    bias = p_ref[:, C:C + 1]                         # (C, 1)
    gamma = p_ref[:, C + 1:C + 2]                    # (C, 1)
    beta = p_ref[:, C + 2:C + 3]                     # (C, 1)

    inv_count = 1.0 / float(N * P)

    s1 = jnp.zeros((C, 1), jnp.float32)
    s2 = jnp.zeros((C, 1), jnp.float32)
    v9s = []

    # Pass 1 (static unroll over the tiny batch): conv-as-FMA, folded
    # elementwise chain, and one-pass BN statistics.
    for n in range(N):
        x = x_ref[n]                                 # (C, P)
        # 1x1 conv == per-pixel channel mix: broadcast FMAs on the VPU.
        # (A 3x3 @ 3xP matmul would waste the MXU and force relayouts.)
        v1 = bias
        for i in range(C):
            v1 = v1 + w_cols[i] * x[i:i + 1, :]      # (C,1)*(1,P) -> (C,P)
        # Exact fold of the chain: v6 = 7 - clamp_min(2 - (7 + clamp_max(v1,8)), -6)
        #                             = min(v1 + 12, 13)
        # v9 = relu6(v1 * v6 / 6)
        v9 = jnp.clip(v1 * jnp.minimum(v1 + 12.0, 13.0) * ONE_SIXTH, 0.0, 6.0)
        v9s.append(v9)
        s1 = s1 + jnp.sum(v9, axis=1, keepdims=True)
        s2 = s2 + jnp.sum(v9 * v9, axis=1, keepdims=True)

    # BatchNorm2d (training mode): biased batch stats over (N, H, W).
    # v9 is bounded in [0, 6], so E[x^2] - E[x]^2 is numerically safe in f32.
    mean = s1 * inv_count
    var = s2 * inv_count - mean * mean
    scale = gamma * jax.lax.rsqrt(var + BN_EPS)      # (C, 1)
    shift = beta - mean * scale                      # (C, 1)

    # Pass 2: single FMA per element to finalize and store.
    for n in range(N):
        o_ref[n] = v9s[n] * scale + shift


def _forward(x_nchw, conv_w, conv_b, bn_gamma, bn_beta):
    """x_nchw: (N, 3, H, W) float32. Returns (N, 3, H+2, W+2) float32."""
    N, C, H, W = x_nchw.shape
    # Conv2d(kernel=1, padding=1): zero-pad spatial dims by 1 on each side.
    x_pad = jnp.pad(x_nchw.astype(jnp.float32),
                    ((0, 0), (0, 0), (1, 1), (1, 1)))
    Hp, Wp = H + 2, W + 2
    P = Hp * Wp
    # Row-major reshape only (no transpose): contiguous view of the padded data.
    x_flat = x_pad.reshape(N, C, P)

    # Pack all small parameters into ONE (C, C+3) VMEM operand:
    #   cols [0:C] = conv weight (out, in), [C] = bias, [C+1] = gamma, [C+2] = beta.
    params = jnp.concatenate(
        [conv_w.reshape(C, C).astype(jnp.float32),
         conv_b.reshape(C, 1).astype(jnp.float32),
         bn_gamma.reshape(C, 1).astype(jnp.float32),
         bn_beta.reshape(C, 1).astype(jnp.float32)],
        axis=1)

    out_flat = pl.pallas_call(
        fused_kernel,
        out_shape=jax.ShapeDtypeStruct((N, C, P), jnp.float32),
        in_specs=[pl.BlockSpec(memory_space=pltpu.MemorySpace.VMEM),
                  pl.BlockSpec(memory_space=pltpu.MemorySpace.VMEM)],
        out_specs=pl.BlockSpec(memory_space=pltpu.MemorySpace.VMEM),
    )(x_flat, params)
    return out_flat.reshape(N, C, Hp, Wp)


model_forward = jax.jit(_forward)


def reference_forward(x_nchw, conv_w, conv_b, bn_gamma, bn_beta):
    """Pure-JAX reference matching the PyTorch forward exactly."""
    x_pad = jnp.pad(x_nchw, ((0, 0), (0, 0), (1, 1), (1, 1)))
    w = conv_w.reshape(3, 3)
    v1 = jnp.einsum("oi,nihw->nohw", w, x_pad) + conv_b[None, :, None, None]
    v2 = jnp.minimum(v1, 8.0)
    v3 = 7.0 + v2
    v4 = 2.0 - v3
    v5 = jnp.maximum(v4, -6.0)
    v6 = 7.0 - v5
    v7 = v6 * v1
    v8 = v7 / 6.0
    v9 = jnp.clip(v8, 0.0, 6.0)
    mean = jnp.mean(v9, axis=(0, 2, 3), keepdims=True)
    var = jnp.mean((v9 - mean) ** 2, axis=(0, 2, 3), keepdims=True)
    xhat = (v9 - mean) * jax.lax.rsqrt(var + BN_EPS)
    return xhat * bn_gamma[None, :, None, None] + bn_beta[None, :, None, None]


if __name__ == "__main__":
    key = jax.random.PRNGKey(0)
    kx, kw, kb = jax.random.split(key, 3)

    # Input matching the module's expected shape (N=2, C=3, H=W=32).
    x1 = jax.random.normal(kx, (2, 3, 32, 32), dtype=jnp.float32)

    # Deterministic parameters (shapes from Conv2d(3,3,1) / BatchNorm2d(3)).
    conv_w = 0.3 * jax.random.normal(kw, (3, 3, 1, 1), dtype=jnp.float32)
    conv_b = 0.1 * jax.random.normal(kb, (3,), dtype=jnp.float32)
    bn_gamma = jnp.ones((3,), dtype=jnp.float32)   # PyTorch default init
    bn_beta = jnp.zeros((3,), dtype=jnp.float32)   # PyTorch default init

    out = model_forward(x1, conv_w, conv_b, bn_gamma, bn_beta)
    out = jax.block_until_ready(out)

    ref = reference_forward(x1, conv_w, conv_b, bn_gamma, bn_beta)
    assert out.shape == (2, 3, 34, 34), out.shape
    assert jnp.allclose(out, ref, atol=1e-4, rtol=1e-4), "mismatch vs reference"

    print("KERNEL_OK")
</pallas_src>

<mosaic_0001>
module attributes {stable_mosaic.version = 11 : i64} {
  func.func @fused_kernel(%arg0: memref<2x3x1156xf32, #tpu.memory_space<vmem>>, %arg1: memref<3x6xf32, #tpu.memory_space<vmem>>, %arg2: memref<2x3x1156xf32, #tpu.memory_space<vmem>>) attributes {dimension_semantics = [], scalar_prefetch = 0 : i64, scratch_operands = 0 : i64, tpu.core_type = #tpu.core_type<tc>} {
    %c0 = arith.constant 0 : index
    %c0_0 = arith.constant 0 : index
    %0 = vector.load %arg1[%c0, %c0_0] : memref<3x6xf32, #tpu.memory_space<vmem>>, vector<3x1xf32>
    %c0_1 = arith.constant 0 : index
    %c1 = arith.constant 1 : index
    %1 = vector.load %arg1[%c0_1, %c1] : memref<3x6xf32, #tpu.memory_space<vmem>>, vector<3x1xf32>
    %c0_2 = arith.constant 0 : index
    %c2 = arith.constant 2 : index
    %2 = vector.load %arg1[%c0_2, %c2] : memref<3x6xf32, #tpu.memory_space<vmem>>, vector<3x1xf32>
    %c0_3 = arith.constant 0 : index
    %c3 = arith.constant 3 : index
    %3 = vector.load %arg1[%c0_3, %c3] : memref<3x6xf32, #tpu.memory_space<vmem>>, vector<3x1xf32>
    %c0_4 = arith.constant 0 : index
    %c4 = arith.constant 4 : index
    %4 = vector.load %arg1[%c0_4, %c4] : memref<3x6xf32, #tpu.memory_space<vmem>>, vector<3x1xf32>
    %c0_5 = arith.constant 0 : index
    %c5 = arith.constant 5 : index
    %5 = vector.load %arg1[%c0_5, %c5] : memref<3x6xf32, #tpu.memory_space<vmem>>, vector<3x1xf32>
    %cst = arith.constant 0.000000e+00 : f32
    %6 = vector.broadcast %cst : f32 to vector<3x1xf32>
    %cst_6 = arith.constant 0.000000e+00 : f32
    %7 = vector.broadcast %cst_6 : f32 to vector<3x1xf32>
    %c0_7 = arith.constant 0 : index
    %c0_8 = arith.constant 0 : index
    %c0_9 = arith.constant 0 : index
    %8 = vector.load %arg0[%c0_7, %c0_8, %c0_9] : memref<2x3x1156xf32, #tpu.memory_space<vmem>>, vector<1x3x1156xf32>
    %9 = vector.shape_cast %8 : vector<1x3x1156xf32> to vector<3x1156xf32>
    %10 = vector.extract_strided_slice %9 {offsets = [0, 0], sizes = [1, 1156], strides = [1, 1]} : vector<3x1156xf32> to vector<1x1156xf32>
    %11 = vector.broadcast %0 : vector<3x1xf32> to vector<3x1156xf32>
    %12 = vector.broadcast %10 : vector<1x1156xf32> to vector<3x1156xf32>
    %13 = arith.mulf %11, %12 : vector<3x1156xf32>
    %14 = vector.broadcast %3 : vector<3x1xf32> to vector<3x1156xf32>
    %15 = arith.addf %14, %13 : vector<3x1156xf32>
    %16 = vector.extract_strided_slice %9 {offsets = [1, 0], sizes = [1, 1156], strides = [1, 1]} : vector<3x1156xf32> to vector<1x1156xf32>
    %17 = vector.broadcast %1 : vector<3x1xf32> to vector<3x1156xf32>
    %18 = vector.broadcast %16 : vector<1x1156xf32> to vector<3x1156xf32>
    %19 = arith.mulf %17, %18 : vector<3x1156xf32>
    %20 = arith.addf %15, %19 : vector<3x1156xf32>
    %21 = vector.extract_strided_slice %9 {offsets = [2, 0], sizes = [1, 1156], strides = [1, 1]} : vector<3x1156xf32> to vector<1x1156xf32>
    %22 = vector.broadcast %2 : vector<3x1xf32> to vector<3x1156xf32>
    %23 = vector.broadcast %21 : vector<1x1156xf32> to vector<3x1156xf32>
    %24 = arith.mulf %22, %23 : vector<3x1156xf32>
    %25 = arith.addf %20, %24 : vector<3x1156xf32>
    %cst_10 = arith.constant 1.200000e+01 : f32
    %26 = vector.broadcast %cst_10 : f32 to vector<3x1156xf32>
    %27 = arith.addf %25, %26 : vector<3x1156xf32>
    %cst_11 = arith.constant 1.300000e+01 : f32
    %28 = vector.broadcast %cst_11 : f32 to vector<3x1156xf32>
    %29 = arith.minimumf %27, %28 : vector<3x1156xf32>
    %30 = arith.mulf %25, %29 : vector<3x1156xf32>
    %cst_12 = arith.constant 0.166666672 : f32
    %31 = vector.broadcast %cst_12 : f32 to vector<3x1156xf32>
    %32 = arith.mulf %30, %31 : vector<3x1156xf32>
    %cst_13 = arith.constant 0.000000e+00 : f32
    %cst_14 = arith.constant 6.000000e+00 : f32
    %33 = vector.broadcast %cst_13 : f32 to vector<3x1156xf32>
    %34 = arith.maximumf %33, %32 : vector<3x1156xf32>
    %35 = vector.broadcast %cst_14 : f32 to vector<3x1156xf32>
    %36 = arith.minimumf %35, %34 : vector<3x1156xf32>
    %cst_15 = arith.constant dense<0.000000e+00> : vector<3xf32>
    %37 = vector.multi_reduction <add>, %36, %cst_15 [1] : vector<3x1156xf32> to vector<3xf32>
    %38 = vector.shape_cast %37 : vector<3xf32> to vector<3x1xf32>
    %39 = arith.addf %6, %38 : vector<3x1xf32>
    %40 = arith.mulf %36, %36 : vector<3x1156xf32>
    %cst_16 = arith.constant dense<0.000000e+00> : vector<3xf32>
    %41 = vector.multi_reduction <add>, %40, %cst_16 [1] : vector<3x1156xf32> to vector<3xf32>
    %42 = vector.shape_cast %41 : vector<3xf32> to vector<3x1xf32>
    %43 = arith.addf %7, %42 : vector<3x1xf32>
    %c1_17 = arith.constant 1 : index
    %c0_18 = arith.constant 0 : index
    %c0_19 = arith.constant 0 : index
    %44 = vector.load %arg0[%c1_17, %c0_18, %c0_19] : memref<2x3x1156xf32, #tpu.memory_space<vmem>>, vector<1x3x1156xf32>
    %45 = vector.shape_cast %44 : vector<1x3x1156xf32> to vector<3x1156xf32>
    %46 = vector.extract_strided_slice %45 {offsets = [0, 0], sizes = [1, 1156], strides = [1, 1]} : vector<3x1156xf32> to vector<1x1156xf32>
    %47 = vector.broadcast %0 : vector<3x1xf32> to vector<3x1156xf32>
    %48 = vector.broadcast %46 : vector<1x1156xf32> to vector<3x1156xf32>
    %49 = arith.mulf %47, %48 : vector<3x1156xf32>
    %50 = vector.broadcast %3 : vector<3x1xf32> to vector<3x1156xf32>
    %51 = arith.addf %50, %49 : vector<3x1156xf32>
    %52 = vector.extract_strided_slice %45 {offsets = [1, 0], sizes = [1, 1156], strides = [1, 1]} : vector<3x1156xf32> to vector<1x1156xf32>
    %53 = vector.broadcast %1 : vector<3x1xf32> to vector<3x1156xf32>
    %54 = vector.broadcast %52 : vector<1x1156xf32> to vector<3x1156xf32>
    %55 = arith.mulf %53, %54 : vector<3x1156xf32>
    %56 = arith.addf %51, %55 : vector<3x1156xf32>
    %57 = vector.extract_strided_slice %45 {offsets = [2, 0], sizes = [1, 1156], strides = [1, 1]} : vector<3x1156xf32> to vector<1x1156xf32>
    %58 = vector.broadcast %2 : vector<3x1xf32> to vector<3x1156xf32>
    %59 = vector.broadcast %57 : vector<1x1156xf32> to vector<3x1156xf32>
    %60 = arith.mulf %58, %59 : vector<3x1156xf32>
    %61 = arith.addf %56, %60 : vector<3x1156xf32>
    %cst_20 = arith.constant 1.200000e+01 : f32
    %62 = vector.broadcast %cst_20 : f32 to vector<3x1156xf32>
    %63 = arith.addf %61, %62 : vector<3x1156xf32>
    %cst_21 = arith.constant 1.300000e+01 : f32
    %64 = vector.broadcast %cst_21 : f32 to vector<3x1156xf32>
    %65 = arith.minimumf %63, %64 : vector<3x1156xf32>
    %66 = arith.mulf %61, %65 : vector<3x1156xf32>
    %cst_22 = arith.constant 0.166666672 : f32
    %67 = vector.broadcast %cst_22 : f32 to vector<3x1156xf32>
    %68 = arith.mulf %66, %67 : vector<3x1156xf32>
    %cst_23 = arith.constant 0.000000e+00 : f32
    %cst_24 = arith.constant 6.000000e+00 : f32
    %69 = vector.broadcast %cst_23 : f32 to vector<3x1156xf32>
    %70 = arith.maximumf %69, %68 : vector<3x1156xf32>
    %71 = vector.broadcast %cst_24 : f32 to vector<3x1156xf32>
    %72 = arith.minimumf %71, %70 : vector<3x1156xf32>
    %cst_25 = arith.constant dense<0.000000e+00> : vector<3xf32>
    %73 = vector.multi_reduction <add>, %72, %cst_25 [1] : vector<3x1156xf32> to vector<3xf32>
    %74 = vector.shape_cast %73 : vector<3xf32> to vector<3x1xf32>
    %75 = arith.addf %39, %74 : vector<3x1xf32>
    %76 = arith.mulf %72, %72 : vector<3x1156xf32>
    %cst_26 = arith.constant dense<0.000000e+00> : vector<3xf32>
    %77 = vector.multi_reduction <add>, %76, %cst_26 [1] : vector<3x1156xf32> to vector<3xf32>
    %78 = vector.shape_cast %77 : vector<3xf32> to vector<3x1xf32>
    %79 = arith.addf %43, %78 : vector<3x1xf32>
    %cst_27 = arith.constant 4.32525965E-4 : f32
    %80 = vector.broadcast %cst_27 : f32 to vector<3x1xf32>
    %81 = arith.mulf %75, %80 : vector<3x1xf32>
    %cst_28 = arith.constant 4.32525965E-4 : f32
    %82 = vector.broadcast %cst_28 : f32 to vector<3x1xf32>
    %83 = arith.mulf %79, %82 : vector<3x1xf32>
    %84 = arith.mulf %81, %81 : vector<3x1xf32>
    %85 = arith.subf %83, %84 : vector<3x1xf32>
    %cst_29 = arith.constant 9.99999974E-6 : f32
    %86 = vector.broadcast %cst_29 : f32 to vector<3x1xf32>
    %87 = arith.addf %85, %86 : vector<3x1xf32>
    %88 = math.rsqrt %87 : vector<3x1xf32>
    %89 = arith.mulf %4, %88 : vector<3x1xf32>
    %90 = arith.mulf %81, %89 : vector<3x1xf32>
    %91 = arith.subf %5, %90 : vector<3x1xf32>
    %92 = vector.broadcast %89 : vector<3x1xf32> to vector<3x1156xf32>
    %93 = arith.mulf %36, %92 : vector<3x1156xf32>
    %94 = vector.broadcast %91 : vector<3x1xf32> to vector<3x1156xf32>
    %95 = arith.addf %93, %94 : vector<3x1156xf32>
    %c0_30 = arith.constant 0 : index
    %c0_31 = arith.constant 0 : index
    %c0_32 = arith.constant 0 : index
    %96 = vector.load %arg2[%c0_30, %c0_31, %c0_32] : memref<2x3x1156xf32, #tpu.memory_space<vmem>>, vector<1x3x1156xf32>
    %97 = vector.shape_cast %96 : vector<1x3x1156xf32> to vector<3x1156xf32>
    %98 = vector.shape_cast %95 : vector<3x1156xf32> to vector<1x3x1156xf32>
    tpu.vector_store %arg2[%c0_30, %c0_31, %c0_32], %98 {strides = array<i32>} : memref<2x3x1156xf32, #tpu.memory_space<vmem>>, vector<1x3x1156xf32>,
    %99 = vector.broadcast %89 : vector<3x1xf32> to vector<3x1156xf32>
    %100 = arith.mulf %72, %99 : vector<3x1156xf32>
    %101 = vector.broadcast %91 : vector<3x1xf32> to vector<3x1156xf32>
    %102 = arith.addf %100, %101 : vector<3x1156xf32>
    %c1_33 = arith.constant 1 : index
    %c0_34 = arith.constant 0 : index
    %c0_35 = arith.constant 0 : index
    %103 = vector.load %arg2[%c1_33, %c0_34, %c0_35] : memref<2x3x1156xf32, #tpu.memory_space<vmem>>, vector<1x3x1156xf32>
    %104 = vector.shape_cast %103 : vector<1x3x1156xf32> to vector<3x1156xf32>
    %105 = vector.shape_cast %102 : vector<3x1156xf32> to vector<1x3x1156xf32>
    tpu.vector_store %arg2[%c1_33, %c0_34, %c0_35], %105 {strides = array<i32>} : memref<2x3x1156xf32, #tpu.memory_space<vmem>>, vector<1x3x1156xf32>,
    return
  }
}

</mosaic_0001>

<bundles_post_ra>
// kernel: _forward.1
= control target key start
LH: loop header
LB: loop body
LE: loop exit
PB: predicated region body
PF: predicated region fallthrough
CT: control target
= control target key end

     0   :  { %v1087_v0 = vmov 0   ;;  %v1088_v2 = vmov 1   ;;  %v1089_v3 = vmov 3   ;;  %v1090_v4 = vmov 2   ;;  %s1093_s4 = smov 1   ;;  %s1825_s1 = inlined_call_operand.vmem [shape: f32[3,6], index: 1, kind: input, shape index: {}]   ;;  %s1826_s0 = inlined_call_operand.vmem [shape: f32[2,3,1156], index: 0, kind: input, shape index: {}]   ;;  %s1827_s2 = inlined_call_operand.vmem [shape: f32[2,3,1156], index: 2, kind: output, shape index: {}]  }
   0x1   :  { %1077 = vset.pattern.permute.xlu0 %v1087_v0  ;;  %v11_v1 = vld [vmem:[%s1825_s1] sm:$0x7]  ;;  %1079 = vset.pattern.permute.xlu1 %v1088_v2  ;;  %v27_v5 = vlaneseq  ;;  %v1119_v9 = vld [vmem:[%s1826_s0 + $0x28] sm:$0x77]  ;;  %v1124_v10 = vld [vmem:[%s1826_s0 + $0x30] sm:$0x77] }
   0x2   :  { %19 = vperm.xlu0 %1077, %v11_v1   ;;  %142 = vperm.xlu1 %1079, %v11_v1   ;;  %v1129_v11 = vld [vmem:[%s1826_s0 + $0x38] sm:$0x77]  ;;  %v1134_v12 = vld [vmem:[%s1826_s0 + $0x40] sm:$0x77]  ;;  %v1147_v17 = vld [vmem:[%s1826_s0 + $0x48] sm:$0x77] }
   0x3   :  { %v28_v6 = vshrl.u32 %v27_v5, 7  ;;  %v1258_v62 = vld [vmem:[%s1826_s0] sm:$0x77]  ;;  %vm429_vm0 = vcmask 1042432   ;;  %vm447_vm1 = vcmask 26624   ;;  %vm1007_vm2 = vcmask 30724  }
   0x4   :  { %vm1787_vm3 = vmor %vm1007_vm2, %vm429_vm0 }
   0x5   :  { %v1112_v7 = vsub.s32 0, %v28_v6  ;;  %v1114_v8 = vsub.s32 4, %v28_v6  ;;  %v1140_v15 = vsub.s32 1, %v28_v6  ;;  %v1142_v16 = vsub.s32 5, %v28_v6 }
   0x6   :  { %1078 = vset.pattern.permute.xlu0 %v1089_v3  ;;  %1080 = vset.pattern.permute.xlu1 %v1090_v4  ;;  %v1157_v22 = vsub.s32 2, %v28_v6  ;;  %v1159_v23 = vsub.s32 6, %v28_v6  ;;  %v1273_v3 = vld [vmem:[%s1826_s0 + $0x8] sm:$0x77] }
   0x7   :  { %128 = vperm.xlu0 %1078, %v11_v1   ;;  %256 = vperm.xlu1 %1080, %v11_v1   ;;  %v499_v13 = vrot.slane %v1119_v9, %v1112_v7  ;;  %v503_v14 = vrot.slane %v1119_v9, %v1114_v8  ;;  %v507_v18 = vrot.slane %v1124_v10, %v1112_v7 }
   0x8   :  { %v511_v19 = vrot.slane %v1124_v10, %v1114_v8  ;;  %v515_v20 = vrot.slane %v1129_v11, %v1112_v7  ;;  %v519_v21 = vrot.slane %v1129_v11, %v1114_v8  ;;  %v523_v24 = vrot.slane %v1134_v12, %v1112_v7 }
   0x9   :  { %v527_v25 = vrot.slane %v1134_v12, %v1114_v8  ;;  %v531_v26 = vrot.slane %v1147_v17, %v1112_v7  ;;  %v535_v27 = vrot.slane %v1147_v17, %v1114_v8  ;;  %v1170_v28 = vrot.slane %v499_v13, %v1112_v7  ;;  %v1299_v13 = vld [vmem:[%s1826_s0 + $0x18] sm:$0x77] }
   0xa   :  { %v1173_v29 = vrot.slane %v503_v14, %v1112_v7  ;;  %v1176_v30 = vrot.slane %v507_v18, %v1112_v7  ;;  %v1179_v31 = vrot.slane %v511_v19, %v1112_v7  ;;  %v609_v32 = vrot.slane %v1119_v9, %v1140_v15  ;;  %v1304_v14 = vld [vmem:[%s1826_s0 + $0x20] sm:$0x77] }
   0xb   :  { %v613_v33 = vrot.slane %v1119_v9, %v1142_v16  ;;  %v1186_v34 = vrot.slane %v515_v20, %v1112_v7  ;;  %v1189_v35 = vrot.slane %v519_v21, %v1112_v7  ;;  %v617_v36 = vrot.slane %v1124_v10, %v1140_v15 }
   0xc   :  { %v621_v37 = vrot.slane %v1124_v10, %v1142_v16  ;;  %v1196_v38 = vrot.slane %v523_v24, %v1112_v7  ;;  %v1199_v39 = vrot.slane %v527_v25, %v1112_v7  ;;  %v625_v40 = vrot.slane %v1129_v11, %v1140_v15 }
   0xd   :  { %v629_v41 = vrot.slane %v1129_v11, %v1142_v16  ;;  %v1206_v42 = vrot.slane %v531_v26, %v1112_v7  ;;  %v1209_v43 = vrot.slane %v535_v27, %v1112_v7  ;;  %v633_v44 = vrot.slane %v1134_v12, %v1140_v15 }
   0xe   :  { %v637_v45 = vrot.slane %v1134_v12, %v1142_v16  ;;  %v641_v46 = vrot.slane %v1147_v17, %v1140_v15  ;;  %v645_v47 = vrot.slane %v1147_v17, %v1142_v16  ;;  %v1220_v48 = vrot.slane %v609_v32, %v1140_v15 }
   0xf   :  { %v1223_v49 = vrot.slane %v613_v33, %v1140_v15  ;;  %v1226_v50 = vrot.slane %v617_v36, %v1140_v15  ;;  %v1229_v51 = vrot.slane %v621_v37, %v1140_v15  ;;  %v719_v52 = vrot.slane %v1119_v9, %v1157_v22 }
  0x10   :  { %v723_v53 = vrot.slane %v1119_v9, %v1159_v23  ;;  %v1236_v54 = vrot.slane %v625_v40, %v1140_v15  ;;  %v1239_v55 = vrot.slane %v629_v41, %v1140_v15  ;;  %v727_v56 = vrot.slane %v1124_v10, %v1157_v22 }
  0x11   :  { %v731_v57 = vrot.slane %v1124_v10, %v1159_v23  ;;  %v1246_v58 = vrot.slane %v633_v44, %v1140_v15  ;;  %v1249_v59 = vrot.slane %v637_v45, %v1140_v15  ;;  %v735_v60 = vrot.slane %v1129_v11, %v1157_v22  ;;  %v1288_v10 = vld [vmem:[%s1826_s0 + $0x10] sm:$0x77] }
  0x12   :  { %v739_v61 = vrot.slane %v1129_v11, %v1159_v23  ;;  %v1261_v63 = vrot.slane %v641_v46, %v1140_v15  ;;  %v1264_v0 = vrot.slane %v645_v47, %v1140_v15  ;;  %v743_v1 = vrot.slane %v1134_v12, %v1157_v22 }
  0x13   :  { %v747_v2 = vrot.slane %v1134_v12, %v1159_v23  ;;  %v751_v4 = vrot.slane %v1147_v17, %v1157_v22  ;;  %v755_v5 = vrot.slane %v1147_v17, %v1159_v23  ;;  %v1280_v6 = vrot.slane %v719_v52, %v1157_v22 }
  0x14   :  { %v1283_v9 = vrot.slane %v723_v53, %v1157_v22  ;;  %v1291_v11 = vrot.slane %v727_v56, %v1157_v22  ;;  %v1294_v12 = vrot.slane %v731_v57, %v1157_v22  ;;  %v30_v17 = vrot.slane %v1258_v62, %v1112_v7 }
  0x15   :  { %v34_v18 = vrot.slane %v1258_v62, %v1114_v8  ;;  %v1311_v19 = vrot.slane %v735_v60, %v1157_v22  ;;  %v1314_v20 = vrot.slane %v739_v61, %v1157_v22  ;;  %v38_v21 = vrot.slane %v1273_v3, %v1112_v7 }
  0x16   :  { %v42_v24 = vrot.slane %v1273_v3, %v1114_v8  ;;  %v1321_v25 = vrot.slane %v743_v1, %v1157_v22  ;;  %v1324_v26 = vrot.slane %v747_v2, %v1157_v22  ;;  %v46_v27 = vrot.slane %v1288_v10, %v1112_v7 }
  0x17   :  { %v50_v32 = vrot.slane %v1288_v10, %v1114_v8  ;;  %v54_v33 = vrot.slane %v1299_v13, %v1112_v7  ;;  %v58_v36 = vrot.slane %v1299_v13, %v1114_v8  ;;  %v62_v37 = vrot.slane %v1304_v14, %v1112_v7 }
  0x18   :  { %v66_v40 = vrot.slane %v1304_v14, %v1114_v8  ;;  %v1339_v41 = vrot.slane %v751_v4, %v1157_v22  ;;  %v1342_v44 = vrot.slane %v755_v5, %v1157_v22  ;;  %v1345_v45 = vrot.slane %v30_v17, %v1112_v7 }
  0x19   :  { %v1348_v46 = vrot.slane %v34_v18, %v1112_v7  ;;  %v1351_v47 = vrot.slane %v38_v21, %v1112_v7  ;;  %v1354_v52 = vrot.slane %v42_v24, %v1112_v7  ;;  %v148_v8 = vrot.slane %v1258_v62, %v1140_v15 }
  0x1a   :  { %v152_v53 = vrot.slane %v1258_v62, %v1142_v16  ;;  %v1361_v56 = vrot.slane %v46_v27, %v1112_v7  ;;  %v1364_v57 = vrot.slane %v50_v32, %v1112_v7  ;;  %v156_v60 = vrot.slane %v1273_v3, %v1140_v15 }
  0x1b   :  { %v160_v61 = vrot.slane %v1273_v3, %v1142_v16  ;;  %v1371_v1 = vrot.slane %v54_v33, %v1112_v7  ;;  %v1374_v2 = vrot.slane %v58_v36, %v1112_v7  ;;  %v1377_v4 = vrot.slane %v62_v37, %v1112_v7 }
  0x1c   :  { %v1380_v5 = vrot.slane %v66_v40, %v1112_v7  ;;  %v164_v17 = vrot.slane %v1288_v10, %v1140_v15  ;;  %v168_v18 = vrot.slane %v1288_v10, %v1142_v16  ;;  %v172_v21 = vrot.slane %v1299_v13, %v1140_v15 }
  0x1d   :  { %1828 = vst [vmem:[#allocation2_spill] sm:$0xff] %v1377_v4  ;;  %v176_v24 = vrot.slane %v1299_v13, %v1142_v16  ;;  %v180_v27 = vrot.slane %v1304_v14, %v1140_v15  ;;  %v184_v32 = vrot.slane %v1304_v14, %v1142_v16  ;;  %v1395_v7 = vrot.slane %v148_v8, %v1140_v15 }
  0x1e   :  { %1829 = vst [vmem:[#allocation3_spill] sm:$0xff] %v1380_v5  ;;  %v1398_v33 = vrot.slane %v152_v53, %v1140_v15  ;;  %v1401_v36 = vrot.slane %v156_v60, %v1140_v15  ;;  %v1404_v37 = vrot.slane %v160_v61, %v1140_v15  ;;  %v262_v40 = vrot.slane %v1258_v62, %v1157_v22 }
  0x1f   :  { %1830 = vst [vmem:[#allocation4_spill] sm:$0xff] %v1395_v7  ;;  %v266_v5 = vrot.slane %v1258_v62, %v1159_v23  ;;  %v270_v16 = vrot.slane %v1273_v3, %v1157_v22  ;;  %v274_v8 = vrot.slane %v1273_v3, %v1159_v23  ;;  %v278_v53 = vrot.slane %v1288_v10, %v1157_v22 }
  0x20   :  { %1831 = vst [vmem:[#allocation5_spill] sm:$0xff] %v1398_v33  ;;  %1832 = vst [vmem:[#allocation6_spill] sm:$0xff] %v1401_v36  ;;  %v282_v60 = vrot.slane %v1288_v10, %v1159_v23  ;;  %v286_v61 = vrot.slane %v1299_v13, %v1157_v22  ;;  %v294_v62 = vrot.slane %v1304_v14, %v1157_v22 }
  0x21   :  { %1833 = vst [vmem:[#allocation7_spill] sm:$0xff] %v1404_v37  ;;  %v290_v37 = vrot.slane %v1299_v13, %v1159_v23  ;;  %v298_v36 = vrot.slane %v1304_v14, %v1159_v23  ;;  %v1427_v3 = vrot.slane %v164_v17, %v1140_v15  ;;  %v1430_v33 = vrot.slane %v168_v18, %v1140_v15 }
  0x22   :  { %v1433_v10 = vrot.slane %v172_v21, %v1140_v15  ;;  %v1436_v7 = vrot.slane %v176_v24, %v1140_v15  ;;  %v1439_v13 = vrot.slane %v180_v27, %v1140_v15  ;;  %v1442_v4 = vrot.slane %v184_v32, %v1140_v15 }
  0x23   :  { %v1445_v23 = vrot.slane %v262_v40, %v1157_v22  ;;  %v1448_v14 = vrot.slane %v266_v5, %v1157_v22  ;;  %v1451_v17 = vrot.slane %v270_v16, %v1157_v22  ;;  %v1454_v18 = vrot.slane %v274_v8, %v1157_v22 }
  0x24   :  { %v1457_v21 = vrot.slane %v278_v53, %v1157_v22  ;;  %v1460_v24 = vrot.slane %v282_v60, %v1157_v22  ;;  %v1467_v32 = vrot.slane %v286_v61, %v1157_v22  ;;  %v1470_v5 = vrot.slane %v290_v37, %v1157_v22 }
  0x25   :  { %1834 = vst [vmem:[#allocation8_spill] sm:$0xff] %v1451_v17  ;;  %1835 = vst [vmem:[#allocation9_spill] sm:$0xff] %v1454_v18  ;;  %v1473_v40 = vrot.slane %v294_v62, %v1157_v22  ;;  %v1476_v16 = vrot.slane %v298_v36, %v1157_v22 }
  0x26   :  { %1836 = vst [vmem:[#allocation10_spill] sm:$0xff] %v1457_v21  ;;  %1837 = vst [vmem:[#allocation11_spill] sm:$0xff] %v1460_v24 }
  0x27   :  { %1838 = vst [vmem:[#allocation12_spill] sm:$0xff] %v1467_v32  ;;  %1839 = vst [vmem:[#allocation13_spill] sm:$0xff] %v1470_v5 }
  0x28   :  { %1840 = vst [vmem:[#allocation14_spill] sm:$0xff] %v1473_v40  ;;  %1841 = vst [vmem:[#allocation15_spill] sm:$0xff] %v1476_v16 }
  0x81   :  { %v1462_v15 = vpop.permute.xlu0 %19  ;;  %v1464_v27 = vpop.permute.xlu1 %142 }
  0x82   :  { %v586_v8 = vmul.f32 %v1170_v28, %v1462_v15  ;;  %v587_v53 = vmul.f32 %v1173_v29, %v1462_v15  ;;  %v588_v60 = vmul.f32 %v1176_v30, %v1462_v15  ;;  %v589_v61 = vmul.f32 %v1179_v31, %v1462_v15 }
  0x83   :  { %v590_v37 = vmul.f32 %v1186_v34, %v1462_v15  ;;  %v591_v62 = vmul.f32 %v1189_v35, %v1462_v15  ;;  %v592_v22 = vmul.f32 %v1196_v38, %v1462_v15  ;;  %v593_v28 = vmul.f32 %v1199_v39, %v1462_v15 }
  0x84   :  { %v594_v29 = vmul.f32 %v1206_v42, %v1462_v15  ;;  %v595_v30 = vmul.f32 %v1209_v43, %v1462_v15  ;;  %v696_v31 = vmul.f32 %v1220_v48, %v1464_v27  ;;  %v697_v34 = vmul.f32 %v1223_v49, %v1464_v27 }
  0x85   :  { %v698_v35 = vmul.f32 %v1226_v50, %v1464_v27  ;;  %v699_v38 = vmul.f32 %v1229_v51, %v1464_v27  ;;  %v700_v39 = vmul.f32 %v1236_v54, %v1464_v27  ;;  %v701_v42 = vmul.f32 %v1239_v55, %v1464_v27 }
  0x86   :  { %v1510_v36 = vpop.permute.xlu0 %128  ;;  %v702_v43 = vmul.f32 %v1246_v58, %v1464_v27  ;;  %v703_v48 = vmul.f32 %v1249_v59, %v1464_v27  ;;  %v704_v49 = vmul.f32 %v1261_v63, %v1464_v27  ;;  %v705_v50 = vmul.f32 %v1264_v0, %v1464_v27  ;;  %v1528_v63 = vpop.permute.xlu1 %256 }
  0x87   :  { %v596_v51 = vadd.f32 %v586_v8, %v1510_v36  ;;  %v597_v54 = vadd.f32 %v587_v53, %v1510_v36  ;;  %v598_v55 = vadd.f32 %v588_v60, %v1510_v36  ;;  %v599_v16 = vadd.f32 %v589_v61, %v1510_v36 }
  0x88   :  { %v600_v40 = vadd.f32 %v590_v37, %v1510_v36  ;;  %v601_v58 = vadd.f32 %v591_v62, %v1510_v36  ;;  %v602_v59 = vadd.f32 %v592_v22, %v1510_v36  ;;  %v603_v5 = vadd.f32 %v593_v28, %v1510_v36 }
  0x89   :  { %v604_v0 = vadd.f32 %v594_v29, %v1510_v36  ;;  %v605_v8 = vadd.f32 %v595_v30, %v1510_v36  ;;  %v706_v32 = vadd.f32 %v696_v31, %v596_v51  ;;  %v707_v53 = vadd.f32 %v697_v34, %v597_v54 }
  0x8a   :  { %v708_v24 = vadd.f32 %v698_v35, %v598_v55  ;;  %v709_v60 = vadd.f32 %v699_v38, %v599_v16  ;;  %v710_v21 = vadd.f32 %v700_v39, %v600_v40  ;;  %v711_v61 = vadd.f32 %v701_v42, %v601_v58 }
  0x8b   :  { %v712_v18 = vadd.f32 %v702_v43, %v602_v59  ;;  %v713_v37 = vadd.f32 %v703_v48, %v603_v5  ;;  %v714_v17 = vadd.f32 %v704_v49, %v604_v0  ;;  %v715_v62 = vadd.f32 %v705_v50, %v605_v8 }
  0x8c   :  { %v806_v22 = vmul.f32 %v1280_v6, %v1528_v63  ;;  %v807_v28 = vmul.f32 %v1283_v9, %v1528_v63  ;;  %v808_v29 = vmul.f32 %v1291_v11, %v1528_v63  ;;  %v809_v30 = vmul.f32 %v1294_v12, %v1528_v63 }
  0x8d   :  { %v810_v40 = vmul.f32 %v1311_v19, %v1528_v63  ;;  %v811_v5 = vmul.f32 %v1314_v20, %v1528_v63  ;;  %v812_v16 = vmul.f32 %v1321_v25, %v1528_v63  ;;  %v813_v6 = vmul.f32 %v1324_v26, %v1528_v63 }
  0x8e   :  { %v814_v9 = vmul.f32 %v1339_v41, %v1528_v63  ;;  %v815_v11 = vmul.f32 %v1342_v44, %v1528_v63  ;;  %v816_v31 = vadd.f32 %v806_v22, %v706_v32  ;;  %v817_v12 = vadd.f32 %v807_v28, %v707_v53 }
  0x8f   :  { %v818_v34 = vadd.f32 %v808_v29, %v708_v24  ;;  %v819_v35 = vadd.f32 %v809_v30, %v709_v60  ;;  %v820_v19 = vadd.f32 %v810_v40, %v710_v21  ;;  %v821_v38 = vadd.f32 %v811_v5, %v711_v61 }
  0x90   :  { %v822_v39 = vadd.f32 %v812_v16, %v712_v18  ;;  %v823_v20 = vadd.f32 %v813_v6, %v713_v37  ;;  %v824_v42 = vadd.f32 %v814_v9, %v714_v17  ;;  %v825_v43 = vadd.f32 %v815_v11, %v715_v62 }
  0x91   :  { %v826_v25 = vadd.f32 12.0, %v816_v31  ;;  %v827_v48 = vadd.f32 12.0, %v817_v12  ;;  %v828_v49 = vadd.f32 12.0, %v818_v34  ;;  %v829_v26 = vadd.f32 12.0, %v819_v35 }
  0x92   :  { %v830_v50 = vadd.f32 12.0, %v820_v19  ;;  %v831_v51 = vadd.f32 12.0, %v821_v38  ;;  %v832_v41 = vadd.f32 12.0, %v822_v39  ;;  %v833_v54 = vadd.f32 12.0, %v823_v20 }
  0x93   :  { %v834_v55 = vadd.f32 12.0, %v824_v42  ;;  %v835_v44 = vadd.f32 12.0, %v825_v43  ;;  %v836_v32 = vmin.f32 %v826_v25, 13.0  ;;  %v837_v58 = vmin.f32 %v827_v48, 13.0 }
  0x94   :  { %v838_v24 = vmin.f32 %v828_v49, 13.0  ;;  %v839_v59 = vmin.f32 %v829_v26, 13.0  ;;  %v840_v21 = vmin.f32 %v830_v50, 13.0  ;;  %v841_v0 = vmin.f32 %v831_v51, 13.0 }
  0x95   :  { %v842_v18 = vmin.f32 %v832_v41, 13.0  ;;  %v843_v17 = vmin.f32 %v833_v54, 13.0  ;;  %v844_v8 = vmin.f32 %v834_v55, 13.0  ;;  %v845_v53 = vmin.f32 %v835_v44, 13.0 }
  0x96   :  { %v846_v60 = vmul.f32 %v836_v32, %v816_v31  ;;  %v847_v61 = vmul.f32 %v837_v58, %v817_v12  ;;  %v848_v37 = vmul.f32 %v838_v24, %v818_v34  ;;  %v849_v62 = vmul.f32 %v839_v59, %v819_v35 }
  0x97   :  { %v850_v22 = vmul.f32 %v840_v21, %v820_v19  ;;  %v851_v28 = vmul.f32 %v841_v0, %v821_v38  ;;  %v852_v29 = vmul.f32 %v842_v18, %v822_v39  ;;  %v853_v30 = vmul.f32 %v843_v17, %v823_v20 }
  0x98   :  { %v854_v40 = vmul.f32 %v844_v8, %v824_v42  ;;  %v855_v5 = vmul.f32 %v845_v53, %v825_v43  ;;  %v856_v16 = vmul.f32 0.16666667, %v846_v60  ;;  %v857_v6 = vmul.f32 0.16666667, %v847_v61 }
  0x99   :  { %v858_v9 = vmul.f32 0.16666667, %v848_v37  ;;  %v859_v11 = vmul.f32 0.16666667, %v849_v62  ;;  %v860_v25 = vmul.f32 0.16666667, %v850_v22  ;;  %v117_v48 = vmul.f32 %v1345_v45, %v1462_v15 }
  0x9a   :  { %v861_v49 = vmul.f32 0.16666667, %v851_v28  ;;  %v862_v31 = vmul.f32 0.16666667, %v852_v29  ;;  %v863_v12 = vmul.f32 0.16666667, %v853_v30  ;;  %v118_v34 = vmul.f32 %v1348_v46, %v1462_v15 }
  0x9b   :  { %v864_v35 = vmul.f32 0.16666667, %v854_v40  ;;  %v865_v19 = vmul.f32 0.16666667, %v855_v5  ;;  %v866_v38 = vmax.f32 %v856_v16, 0.0  ;;  %v867_v39 = vmax.f32 %v857_v6, 0.0 }
  0x9c   :  { %v868_v20 = vmax.f32 %v858_v9, 0.0  ;;  %v869_v42 = vmax.f32 %v859_v11, 0.0  ;;  %v870_v43 = vmax.f32 %v860_v25, 0.0  ;;  %v871_v26 = vmax.f32 %v861_v49, 0.0  ;;  %v1842_v49 = vld [vmem:[#allocation2_spill] sm:$0xff] }
  0x9d   :  { %v872_v50 = vmax.f32 %v862_v31, 0.0  ;;  %v873_v51 = vmax.f32 %v863_v12, 0.0  ;;  %v874_v41 = vmax.f32 %v864_v35, 0.0  ;;  %v875_v54 = vmax.f32 %v865_v19, 0.0 }
  0x9e   :  { %v1556_v55 = vmin.f32 %v866_v38, 6.0  ;;  %v1558_v45 = vmin.f32 %v867_v39, 6.0  ;;  %v1560_v44 = vmin.f32 %v868_v20, 6.0  ;;  %v1562_v32 = vmin.f32 %v869_v42, 6.0  ;;  %v1845_v42 = vld [vmem:[#allocation5_spill] sm:$0xff] }
  0x9f   :  { %v1564_v46 = vmin.f32 %v870_v43, 6.0  ;;  %v1566_v58 = vmin.f32 %v871_v26, 6.0  ;;  %v1568_v24 = vmin.f32 %v872_v50, 6.0  ;;  %v1570_v59 = vmin.f32 %v873_v51, 6.0  ;;  %v1846_v50 = vld [vmem:[#allocation6_spill] sm:$0xff] }
  0xa0   :  { %v1572_v21 = vmin.f32 %v874_v41, 6.0  ;;  %v1574_v0 = vmin.f32 %v875_v54, 6.0  ;;  %v886_v18 = vsel %vm429_vm0, %v1556_v55, 0.0  ;;  %v887_v17 = vsel %vm429_vm0, %v1558_v45, 0.0  ;;  %v1847_v41 = vld [vmem:[#allocation7_spill] sm:$0xff] }
  0xa1   :  { %v888_v8 = vadd.f32 %v887_v17, %v886_v18  ;;  %v889_v53 = vsel %vm429_vm0, %v1560_v44, 0.0  ;;  %v891_v60 = vsel %vm429_vm0, %v1562_v32, 0.0  ;;  %v893_v61 = vsel %vm429_vm0, %v1564_v46, 0.0 }
  0xa2   :  { %v895_v37 = vsel %vm429_vm0, %v1566_v58, 0.0  ;;  %v897_v62 = vsel %vm429_vm0, %v1568_v24, 0.0  ;;  %v899_v22 = vsel %vm429_vm0, %v1570_v59, 0.0  ;;  %v901_v28 = vsel %vm429_vm0, %v1572_v21, 0.0 }
  0xa3   :  { %v890_v29 = vadd.f32 %v889_v53, %v888_v8  ;;  %v903_v30 = vsel %vm447_vm1, %v1574_v0, 0.0  ;;  %v119_v40 = vmul.f32 %v1351_v47, %v1462_v15  ;;  %v120_v5 = vmul.f32 %v1354_v52, %v1462_v15  ;;  %v1843_v47 = vld [vmem:[#allocation3_spill] sm:$0xff] }
  0xa4   :  { %v121_v16 = vmul.f32 %v1361_v56, %v1462_v15  ;;  %v122_v6 = vmul.f32 %v1364_v57, %v1462_v15  ;;  %v123_v9 = vmul.f32 %v1371_v1, %v1462_v15  ;;  %v124_v11 = vmul.f32 %v1374_v2, %v1462_v15 }
  0xa5   :  { %v892_v25 = vadd.f32 %v891_v60, %v890_v29  ;;  %v125_v31 = vmul.f32 %v1842_v49, %v1462_v15  ;;  %v126_v12 = vmul.f32 %v1843_v47, %v1462_v15  ;;  %v131_v52 = vadd.f32 %v1510_v36, %v117_v48  ;;  %v1844_v48 = vld [vmem:[#allocation4_spill] sm:$0xff]  ;;  %v1851_v47 = vld [vmem:[#allocation11_spill] sm:$0xff] }
  0xa6   :  { %v132_v56 = vadd.f32 %v1510_v36, %v118_v34  ;;  %v133_v35 = vadd.f32 %v1510_v36, %v119_v40  ;;  %v134_v57 = vadd.f32 %v1510_v36, %v120_v5  ;;  %v135_v1 = vadd.f32 %v1510_v36, %v121_v16 }
  0xa7   :  { %v894_v19 = vadd.f32 %v893_v61, %v892_v25  ;;  %v136_v2 = vadd.f32 %v1510_v36, %v122_v6  ;;  %v137_v38 = vadd.f32 %v1510_v36, %v123_v9  ;;  %v138_v39 = vadd.f32 %v1510_v36, %v124_v11  ;;  %v1849_v25 = vld [vmem:[#allocation9_spill] sm:$0xff] }
  0xa8   :  { %v139_v20 = vadd.f32 %v1510_v36, %v125_v31  ;;  %v140_v15 = vadd.f32 %v1510_v36, %v126_v12  ;;  %v235_v34 = vmul.f32 %v1844_v48, %v1464_v27  ;;  %v236_v43 = vmul.f32 %v1845_v42, %v1464_v27  ;;  %v1850_v31 = vld [vmem:[#allocation10_spill] sm:$0xff] }
  0xa9   :  { %v896_v26 = vadd.f32 %v895_v37, %v894_v19  ;;  %v237_v51 = vmul.f32 %v1846_v50, %v1464_v27  ;;  %v238_v54 = vmul.f32 %v1847_v41, %v1464_v27  ;;  %v239_v18 = vmul.f32 %v1427_v3, %v1464_v27 }
  0xaa   :  { %v240_v17 = vmul.f32 %v1430_v33, %v1464_v27  ;;  %v241_v36 = vmul.f32 %v1433_v10, %v1464_v27  ;;  %v242_v8 = vmul.f32 %v1436_v7, %v1464_v27  ;;  %v243_v53 = vmul.f32 %v1439_v13, %v1464_v27 }
  0xab   :  { %v898_v60 = vadd.f32 %v897_v62, %v896_v26  ;;  %v244_v61 = vmul.f32 %v1442_v4, %v1464_v27  ;;  %v245_v37 = vadd.f32 %v235_v34, %v131_v52  ;;  %v246_v29 = vadd.f32 %v236_v43, %v132_v56  ;;  %v1848_v62 = vld [vmem:[#allocation8_spill] sm:$0xff] }
  0xac   :  { %v247_v40 = vadd.f32 %v237_v51, %v133_v35  ;;  %v248_v3 = vadd.f32 %v238_v54, %v134_v57  ;;  %v249_v5 = vadd.f32 %v239_v18, %v135_v1  ;;  %v250_v16 = vadd.f32 %v240_v17, %v136_v2  ;;  %v1852_v52 = vld [vmem:[#allocation12_spill] sm:$0xff] }
  0xad   :  { %v900_v33 = vadd.f32 %v899_v22, %v898_v60  ;;  %v251_v6 = vadd.f32 %v241_v36, %v137_v38  ;;  %v252_v9 = vadd.f32 %v242_v8, %v138_v39  ;;  %v253_v10 = vadd.f32 %v243_v53, %v139_v20 }
  0xae   :  { %v254_v11 = vadd.f32 %v244_v61, %v140_v15  ;;  %v349_v7 = vmul.f32 %v1445_v23, %v1528_v63  ;;  %v350_v13 = vmul.f32 %v1448_v14, %v1528_v63  ;;  %v351_v4 = vmul.f32 %v1848_v62, %v1528_v63  ;;  %v1853_v23 = vld [vmem:[#allocation13_spill] sm:$0xff]  ;;  %v1854_v14 = vld [vmem:[#allocation14_spill] sm:$0xff] }
  0xaf   :  { %v902_v27 = vadd.f32 %v901_v28, %v900_v33  ;;  %v352_v49 = vmul.f32 %v1849_v25, %v1528_v63  ;;  %v353_v22 = vmul.f32 %v1850_v31, %v1528_v63  ;;  %v354_v12 = vmul.f32 %v1851_v47, %v1528_v63  ;;  %v1855_v28 = vld [vmem:[#allocation15_spill] sm:$0xff] }
  0xb0   :  { %v355_v56 = vmul.f32 %v1852_v52, %v1528_v63  ;;  %v356_v35 = vmul.f32 %v1853_v23, %v1528_v63  ;;  %v357_v57 = vmul.f32 %v1854_v14, %v1528_v63  ;;  %v358_v1 = vmul.f32 %v1855_v28, %v1528_v63 }
  0xb1   :  { %v904_v19 = vadd.f32 %v903_v30, %v902_v27  ;;  %v359_v2 = vadd.f32 %v349_v7, %v245_v37  ;;  %v360_v38 = vadd.f32 %v350_v13, %v246_v29  ;;  %v361_v39 = vadd.f32 %v351_v4, %v247_v40 }
  0xb2   :  { %v362_v20 = vadd.f32 %v352_v49, %v248_v3  ;;  %v363_v15 = vadd.f32 %v353_v22, %v249_v5  ;;  %v364_v48 = vadd.f32 %v354_v12, %v250_v16  ;;  %v365_v34 = vadd.f32 %v355_v56, %v251_v6 }
  0xb3   :  { %905 = vadd.xlane.f32.xlu0 %v904_v19  ;;  %v366_v42 = vadd.f32 %v356_v35, %v252_v9  ;;  %v367_v43 = vadd.f32 %v357_v57, %v253_v10  ;;  %v368_v26 = vadd.f32 %v358_v1, %v254_v11  ;;  %v369_v50 = vadd.f32 12.0, %v359_v2 }
  0xb4   :  { %v370_v51 = vadd.f32 12.0, %v360_v38  ;;  %v371_v41 = vadd.f32 12.0, %v361_v39  ;;  %v372_v54 = vadd.f32 12.0, %v362_v20  ;;  %v373_v18 = vadd.f32 12.0, %v363_v15 }
  0xb5   :  { %v374_v17 = vadd.f32 12.0, %v364_v48  ;;  %v375_v36 = vadd.f32 12.0, %v365_v34  ;;  %v376_v63 = vadd.f32 12.0, %v366_v42  ;;  %v379_v30 = vmin.f32 %v369_v50, 13.0 }
  0xb6   :  { %v380_v8 = vmin.f32 %v370_v51, 13.0  ;;  %v381_v53 = vmin.f32 %v371_v41, 13.0  ;;  %v382_v60 = vmin.f32 %v372_v54, 13.0  ;;  %v383_v61 = vmin.f32 %v373_v18, 13.0 }
  0xb7   :  { %v384_v37 = vmin.f32 %v374_v17, 13.0  ;;  %v377_v29 = vadd.f32 12.0, %v367_v43  ;;  %v378_v40 = vadd.f32 12.0, %v368_v26  ;;  %v385_v3 = vmin.f32 %v375_v36, 13.0 }
  0xb8   :  { %v389_v5 = vmul.f32 %v379_v30, %v359_v2  ;;  %v390_v16 = vmul.f32 %v380_v8, %v360_v38  ;;  %v391_v33 = vmul.f32 %v381_v53, %v361_v39  ;;  %v392_v6 = vmul.f32 %v382_v60, %v362_v20 }
  0xb9   :  { %v393_v9 = vmul.f32 %v383_v61, %v363_v15  ;;  %v386_v10 = vmin.f32 %v376_v63, 13.0  ;;  %v394_v11 = vmul.f32 %v384_v37, %v364_v48  ;;  %v387_v4 = vmin.f32 %v377_v29, 13.0 }
  0xba   :  { %v399_v7 = vmul.f32 0.16666667, %v389_v5  ;;  %v400_v13 = vmul.f32 0.16666667, %v390_v16  ;;  %v401_v62 = vmul.f32 0.16666667, %v391_v33  ;;  %v395_v25 = vmul.f32 %v385_v3, %v365_v34 }
  0xbb   :  { %v388_v27 = vmin.f32 %v378_v40, 13.0  ;;  %v402_v49 = vmul.f32 0.16666667, %v392_v6  ;;  %v403_v31 = vmul.f32 0.16666667, %v393_v9  ;;  %v396_v22 = vmul.f32 %v386_v10, %v366_v42 }
  0xbc   :  { %v409_v47 = vmax.f32 %v399_v7, 0.0  ;;  %v410_v12 = vmax.f32 %v400_v13, 0.0  ;;  %v411_v52 = vmax.f32 %v401_v62, 0.0  ;;  %v404_v56 = vmul.f32 0.16666667, %v394_v11 }
  0xbd   :  { %v412_v23 = vmax.f32 %v402_v49, 0.0  ;;  %v397_v35 = vmul.f32 %v387_v4, %v367_v43  ;;  %v398_v14 = vmul.f32 %v388_v27, %v368_v26  ;;  %v405_v57 = vmul.f32 0.16666667, %v395_v25 }
  0xbe   :  { %v1662_v28 = vmin.f32 %v409_v47, 6.0  ;;  %v413_v1 = vmax.f32 %v403_v31, 0.0  ;;  %v1664_v19 = vmin.f32 %v410_v12, 6.0  ;;  %v1666_v2 = vmin.f32 %v411_v52, 6.0 }
  0xbf   :  { %v406_v38 = vmul.f32 0.16666667, %v396_v22  ;;  %v414_v39 = vmax.f32 %v404_v56, 0.0  ;;  %v1668_v20 = vmin.f32 %v412_v23, 6.0  ;;  %v407_v34 = vmul.f32 0.16666667, %v397_v35 }
  0xc0   :  { %v430_v15 = vsel %vm429_vm0, %v1662_v28, 0.0  ;;  %v431_v48 = vsel %vm429_vm0, %v1664_v19, 0.0  ;;  %v408_v42 = vmul.f32 0.16666667, %v398_v14  ;;  %v415_v43 = vmax.f32 %v405_v57, 0.0 }
  0xc1   :  { %v432_v26 = vadd.f32 %v431_v48, %v430_v15  ;;  %v1674_v50 = vmin.f32 %v413_v1, 6.0  ;;  %v433_v51 = vsel %vm429_vm0, %v1666_v2, 0.0  ;;  %v416_v41 = vmax.f32 %v406_v38, 0.0 }
  0xc2   :  { %v453_v18 = vmul.f32 %v1662_v28, %v1662_v28  ;;  %v454_v17 = vmul.f32 %v1664_v19, %v1664_v19  ;;  %v1682_v36 = vmin.f32 %v414_v39, 6.0  ;;  %v435_v63 = vsel %vm429_vm0, %v1668_v20, 0.0 }
  0xc3   :  { %v434_v54 = vadd.f32 %v433_v51, %v432_v26  ;;  %v455_v30 = vmul.f32 %v1666_v2, %v1666_v2  ;;  %v417_v8 = vmax.f32 %v407_v34, 0.0  ;;  %v418_v53 = vmax.f32 %v408_v42, 0.0 }
  0xc4   :  { %v1688_v60 = vmin.f32 %v415_v43, 6.0  ;;  %v437_v37 = vsel %vm429_vm0, %v1674_v50, 0.0  ;;  %v456_v29 = vmul.f32 %v1668_v20, %v1668_v20  ;;  %v463_v40 = vsel %vm429_vm0, %v453_v18, 0.0 }
  0xc5   :  { %v436_v61 = vadd.f32 %v435_v63, %v434_v54  ;;  %v464_v3 = vsel %vm429_vm0, %v454_v17, 0.0  ;;  %v1696_v5 = vmin.f32 %v416_v41, 6.0  ;;  %v908_v6 = vmul.f32 %v1556_v55, %v1556_v55 }
  0xc6   :  { %v465_v33 = vadd.f32 %v464_v3, %v463_v40  ;;  %v439_v9 = vsel %vm429_vm0, %v1682_v36, 0.0  ;;  %v457_v10 = vmul.f32 %v1674_v50, %v1674_v50  ;;  %v466_v11 = vsel %vm429_vm0, %v455_v30, 0.0 }
  0xc7   :  { %v438_v16 = vadd.f32 %v437_v37, %v436_v61  ;;  %v909_v7 = vmul.f32 %v1558_v45, %v1558_v45  ;;  %v1707_v13 = vmin.f32 %v417_v8, 6.0  ;;  %v1709_v62 = vmin.f32 %v418_v53, 6.0 }
  0xc8   :  { %v467_v27 = vadd.f32 %v466_v11, %v465_v33  ;;  %v441_v25 = vsel %vm429_vm0, %v1688_v60, 0.0  ;;  %v458_v49 = vmul.f32 %v1682_v36, %v1682_v36  ;;  %v468_v31 = vsel %vm429_vm0, %v456_v29, 0.0 }
  0xc9   :  { %v440_v4 = vadd.f32 %v439_v9, %v438_v16  ;;  %v910_v22 = vmul.f32 %v1560_v44, %v1560_v44  ;;  %v443_v12 = vsel %vm429_vm0, %v1696_v5, 0.0  ;;  %v459_v52 = vmul.f32 %v1688_v60, %v1688_v60 }
  0xca   :  { %v469_v56 = vadd.f32 %v468_v31, %v467_v27  ;;  %v470_v23 = vsel %vm429_vm0, %v457_v10, 0.0  ;;  %v911_v35 = vmul.f32 %v1562_v32, %v1562_v32  ;;  %v918_v14 = vsel %vm429_vm0, %v908_v6, 0.0 }
  0xcb   :  { %v442_v47 = vadd.f32 %v441_v25, %v440_v4  ;;  %v919_v57 = vsel %vm429_vm0, %v909_v7, 0.0  ;;  %v445_v38 = vsel %vm429_vm0, %v1707_v13, 0.0  ;;  %v460_v48 = vmul.f32 %v1696_v5, %v1696_v5 }
  0xcc   :  { %v471_v39 = vadd.f32 %v470_v23, %v469_v56  ;;  %v920_v15 = vadd.f32 %v919_v57, %v918_v14  ;;  %v472_v34 = vsel %vm429_vm0, %v458_v49, 0.0  ;;  %v912_v42 = vmul.f32 %v1564_v46, %v1564_v46 }
  0xcd   :  { %v444_v1 = vadd.f32 %v443_v12, %v442_v47  ;;  %v921_v43 = vsel %vm429_vm0, %v910_v22, 0.0  ;;  %v448_v51 = vsel %vm447_vm1, %v1709_v62, 0.0  ;;  %v461_v18 = vmul.f32 %v1707_v13, %v1707_v13 }
  0xce   :  { %v473_v41 = vadd.f32 %v472_v34, %v471_v39  ;;  %v922_v54 = vadd.f32 %v921_v43, %v920_v15  ;;  %v474_v17 = vsel %vm429_vm0, %v459_v52, 0.0  ;;  %v913_v63 = vmul.f32 %v1566_v58, %v1566_v58 }
  0xcf   :  { %v446_v26 = vadd.f32 %v445_v38, %v444_v1  ;;  %v923_v30 = vsel %vm429_vm0, %v911_v35, 0.0  ;;  %v462_v37 = vmul.f32 %v1709_v62, %v1709_v62  ;;  %v476_v29 = vsel %vm429_vm0, %v460_v48, 0.0 }
  0xd0   :  { %v475_v53 = vadd.f32 %v474_v17, %v473_v41  ;;  %v924_v61 = vadd.f32 %v923_v30, %v922_v54  ;;  %v914_v40 = vmul.f32 %v1568_v24, %v1568_v24  ;;  %v925_v3 = vsel %vm429_vm0, %v912_v42, 0.0 }
  0xd1   :  { %v449_v8 = vadd.f32 %v448_v51, %v446_v26  ;;  %v478_v6 = vsel %vm429_vm0, %v461_v18, 0.0  ;;  %v915_v9 = vmul.f32 %v1570_v59, %v1570_v59  ;;  %v927_v10 = vsel %vm429_vm0, %v913_v63, 0.0  ;;  %v1086_v18 = vld [vmem:[%s1825_s1] sm:$0x7] }
  0xd2   :  { %v477_v16 = vadd.f32 %v476_v29, %v475_v53  ;;  %v926_v33 = vadd.f32 %v925_v3, %v924_v61  ;;  %v480_v4 = vsel %vm447_vm1, %v462_v37, 0.0  ;;  %v916_v27 = vmul.f32 %v1572_v21, %v1572_v21 }
  0xd3   :  { %450 = vadd.xlane.f32.xlu1 %v449_v8  ;;  %v929_v25 = vsel %vm429_vm0, %v914_v40, 0.0  ;;  %v917_v22 = vmul.f32 %v1574_v0, %v1574_v0  ;;  %v931_v47 = vsel %vm429_vm0, %v915_v9, 0.0  ;;  %v1091_v14 = vmov 4  }
  0xd4   :  { %v479_v11 = vadd.f32 %v478_v6, %v477_v16  ;;  %v928_v7 = vadd.f32 %v927_v10, %v926_v33  ;;  %v933_v52 = vsel %vm429_vm0, %v916_v27, 0.0  ;;  %1081 = vset.pattern.permute.xlu1 %v1091_v14  ;;  %v1092_v41 = vmov 5  }
  0xd5   :  { %v935_v23 = vsel %vm447_vm1, %v917_v22, 0.0  ;;  %1083 = vset.pattern.permute.xlu0 %v1092_v41 }
  0xd6   :  { %v481_v49 = vadd.f32 %v480_v4, %v479_v11  ;;  %v930_v31 = vadd.f32 %v929_v25, %v928_v7 }
  0xd8   :  { %482 = vadd.xlane.f32.xlu0 %v481_v49  ;;  %v932_v12 = vadd.f32 %v931_v47, %v930_v31 }
  0xda   :  { %v934_v56 = vadd.f32 %v933_v52, %v932_v12 }
  0xdc   :  { %v936_v35 = vadd.f32 %v935_v23, %v934_v56 }
  0xde   :  { %937 = vadd.xlane.f32.xlu1 %v936_v35 }
 0x140   :  { %v906_v57 = vpop.xlane.xlu0 %905 }
 0x160   :  { %v451_v1 = vpop.xlane.xlu1 %450 }
 0x161   :  { %v907_v38 = vadd.f32 %v906_v57, %v451_v1 }
 0x163   :  { %v940_v15 = vmul.f32 0.00043252597, %v907_v38 }
 0x165   :  { %v483_v39 = vpop.xlane.xlu0 %482  ;;  %v942_v42 = vmul.f32 %v940_v15, %v940_v15 }
 0x16b   :  { %v938_v48 = vpop.xlane.xlu1 %937 }
 0x16c   :  { %v939_v34 = vadd.f32 %v938_v48, %v483_v39 }
 0x16e   :  { %v941_v43 = vmul.f32 0.00043252597, %v939_v34 }
 0x170   :  { %v943_v26 = vsub.f32 %v941_v43, %v942_v42 }
 0x172   :  { %v944_v51 = vadd.f32 1e-05, %v943_v26 }
 0x174   :  { %1084 = vrsqrt.f32 %v944_v51 }
 0x17e   :  { %v1085_v54 = vpop.eup %1084 }
 0x17f   :  { %v946_v17 = vmul.f32 %v1086_v18, %v1085_v54 }
 0x181   :  { %955 = vperm.xlu1 %1081, %v946_v17   ;;  %v947_v63 = vmul.f32 %v946_v17, %v940_v15 }
 0x183   :  { %949 = vrot.lane.b32.xlu0 %v947_v63, %s1093_s4 }
 0x185   :  { %1082 = vset.pattern.permute.xlu1 %v1092_v41 }
 0x1f5   :  { %v950_v30 = vpop.permute.xlu0 %949 }
 0x1f6   :  { %v952_v8 = vsub.f32 %v1086_v18, %v950_v30 }
 0x1f8   :  { %970 = vperm.xlu1 %1082, %v952_v8  }
 0x200   :  { %v956_v53 = vpop.permute.xlu1 %955 }
 0x201   :  { %v958_v61 = vmul.f32 %v956_v53, %v1662_v28  ;;  %v959_v37 = vmul.f32 %v956_v53, %v1664_v19  ;;  %v960_v29 = vmul.f32 %v956_v53, %v1666_v2  ;;  %v961_v40 = vmul.f32 %v956_v53, %v1668_v20 }
 0x202   :  { %v962_v3 = vmul.f32 %v956_v53, %v1674_v50  ;;  %v963_v16 = vmul.f32 %v956_v53, %v1682_v36  ;;  %v964_v33 = vmul.f32 %v956_v53, %v1688_v60  ;;  %v965_v6 = vmul.f32 %v956_v53, %v1696_v5 }
 0x203   :  { %v966_v9 = vmul.f32 %v956_v53, %v1707_v13  ;;  %v967_v10 = vmul.f32 %v956_v53, %v1709_v62  ;;  %v1010_v28 = vmul.f32 %v956_v53, %v1556_v55  ;;  %v1011_v19 = vmul.f32 %v956_v53, %v1558_v45 }
 0x204   :  { %v1012_v2 = vmul.f32 %v956_v53, %v1560_v44  ;;  %v1013_v20 = vmul.f32 %v956_v53, %v1562_v32  ;;  %v1014_v50 = vmul.f32 %v956_v53, %v1564_v46  ;;  %v1015_v36 = vmul.f32 %v956_v53, %v1566_v58 }
 0x205   :  { %v1016_v60 = vmul.f32 %v956_v53, %v1568_v24  ;;  %v1017_v5 = vmul.f32 %v956_v53, %v1570_v59  ;;  %v1018_v13 = vmul.f32 %v956_v53, %v1572_v21  ;;  %v1019_v62 = vmul.f32 %v956_v53, %v1574_v0 }
 0x277   :  { %v971_v11 = vpop.permute.xlu1 %970 }
 0x278   :  { %v973_v55 = vadd.f32 %v971_v11, %v958_v61  ;;  %v974_v7 = vadd.f32 %v971_v11, %v959_v37  ;;  %v975_v45 = vadd.f32 %v971_v11, %v960_v29  ;;  %v976_v4 = vadd.f32 %v971_v11, %v961_v40 }
 0x279   :  { %v977_v44 = vadd.f32 %v971_v11, %v962_v3  ;;  %v978_v27 = vadd.f32 %v971_v11, %v963_v16  ;;  %v979_v32 = vadd.f32 %v971_v11, %v964_v33  ;;  %v980_v25 = vadd.f32 %v971_v11, %v965_v6 }
 0x27a   :  { %v981_v46 = vadd.f32 %v971_v11, %v966_v9  ;;  %v982_v49 = vadd.f32 %v971_v11, %v967_v10  ;;  %v993_v58 = vcombine.low %v973_v55, %v974_v7  ;;  %v994_v31 = vcombine.low %v975_v45, %v976_v4 }
 0x27b   :  { %v995_v59 = vcombine.low %v977_v44, %v978_v27  ;;  %v996_v21 = vcombine.low %v979_v32, %v980_v25  ;;  %v1020_v0 = vadd.f32 %v1010_v28, %v971_v11  ;;  %v1021_v22 = vadd.f32 %v1011_v19, %v971_v11 }
 0x27c   :  { %v997_v47 = vcombine.low %v981_v46, %v982_v49  ;;  %1003 = vst [vmem:[%s1827_s2] sm:$0x77] %v993_v58  ;;  %1004 = vst [vmem:[%s1827_s2 + $0x8] sm:$0x77] %v994_v31  ;;  %v1022_v12 = vadd.f32 %v1012_v2, %v971_v11  ;;  %v1023_v52 = vadd.f32 %v1013_v20, %v971_v11 }
 0x27d   :  { %v1024_v56 = vadd.f32 %v1014_v50, %v971_v11  ;;  %1005 = vst [vmem:[%s1827_s2 + $0x10] sm:$0x77] %v995_v59  ;;  %1006 = vst [vmem:[%s1827_s2 + $0x18] sm:$0x77] %v996_v21  ;;  %v1025_v23 = vadd.f32 %v1015_v36, %v971_v11  ;;  %v1026_v35 = vadd.f32 %v1016_v60, %v971_v11 }
 0x27e   :  { %v1027_v14 = vadd.f32 %v1017_v5, %v971_v11  ;;  %v1028_v57 = vadd.f32 %v1018_v13, %v971_v11  ;;  %1009 = vst.msk [vmem:[%s1827_s2 + $0x20] sm:$0x77] %vm1787_vm3, %v997_v47  ;;  %v1029_v1 = vadd.f32 %v1019_v62, %v971_v11  ;;  %v1040_v38 = vcombine.low %v1020_v0, %v1021_v22 }
 0x27f   :  { %v1041_v39 = vcombine.low %v1022_v12, %v1023_v52  ;;  %v1042_v15 = vcombine.low %v1024_v56, %v1025_v23 }
 0x280   :  { %v1043_v48 = vcombine.low %v1026_v35, %v1027_v14  ;;  %v1044_v34 = vcombine.low %v1028_v57, %v1029_v1  ;;  %1065 = vst [vmem:[%s1827_s2 + $0x28] sm:$0x77] %v1040_v38 }
 0x281   :  { %1066 = vst [vmem:[%s1827_s2 + $0x30] sm:$0x77] %v1041_v39  ;;  %1067 = vst [vmem:[%s1827_s2 + $0x38] sm:$0x77] %v1042_v15 }
 0x282   :  { %1068 = vst [vmem:[%s1827_s2 + $0x40] sm:$0x77] %v1043_v48  ;;  %1069 = vst.msk [vmem:[%s1827_s2 + $0x48] sm:$0x77] %vm1787_vm3, %v1044_v34 }

</bundles_post_ra>
